<compile_context>
chip_gen: v7x
topology: tpu7x:2x2x1
jax: 0.10.0
libtpu: 0.0.40
codegen_flags: <defaults>
</compile_context>

<pallas_src>
from typing import NamedTuple

import jax
import jax.numpy as jnp
from jax.experimental import pallas as pl
from jax.experimental.pallas import tpu as pltpu


def _cdiv(a, b):
    return (a + b - 1) // b


def _round_up(x, m):
    return _cdiv(x, m) * m


# ---------------------------------------------------------------------------
# Kernel: one (row-tile i, d_ff-chunk k) step of  fc2(relu(fc1(x)+b1)) + b2
# ---------------------------------------------------------------------------
def ffn_kernel(x_ref, w1_ref, b1_ref, w2_ref, b2_ref, o_ref, acc_ref):
    # x_ref:  (tm, Din)   input dtype      w1_ref: (Din, tk)  bf16   b1_ref: (1, tk) f32
    # w2_ref: (tk, Dout)  bf16             b2_ref: (1, Dout)  f32
    # o_ref:  (tm, Dout)  out dtype        acc_ref:(tm, Dout) f32 scratch
    k = pl.program_id(1)

    @pl.when(k == 0)
    def _():
        acc_ref[...] = jnp.zeros_like(acc_ref)

    xb = x_ref[...].astype(jnp.bfloat16)          # in-kernel cast (saves an HBM pass)
    h = jnp.dot(xb, w1_ref[...], preferred_element_type=jnp.float32)
    h = jnp.maximum(h + b1_ref[...], 0.0)         # bias + ReLU in f32
    # TODO(synk): dropout implemented as identity (eval-mode semantics); training mode
    # needs a Bernoulli mask via pltpu.prng_seed + pltpu.prng_random_bits.
    acc_ref[...] += jnp.dot(h.astype(w2_ref.dtype), w2_ref[...],
                            preferred_element_type=jnp.float32)

    @pl.when(k == pl.num_programs(1) - 1)
    def _():
        o_ref[...] = (acc_ref[...] + b2_ref[...]).astype(o_ref.dtype)


# ---------------------------------------------------------------------------
# One-time weight preprocessing (hoisted out of the per-call path)
# ---------------------------------------------------------------------------
class PreparedFFN(NamedTuple):
    w1: jax.Array   # (Din, Dff)  bf16
    b1: jax.Array   # (1, Dff)    f32
    w2: jax.Array   # (Dff, Dout) bf16
    b2: jax.Array   # (1, Dout)   f32
    d_model: int
    d_ff: int
    fold: int       # rows packed per lane-dense row (1 = no folding)
    Din: int
    Dff: int
    Dout: int


def prepare_ffn_params(w1, b1, w2, b2, *, fold_max_dff=1024):
    """Fold/pad/cast weights once; reuse the result for every forward call."""
    d_model, d_ff = w1.shape

    # Lane-dense folding: pack 128//d_model consecutive rows into one 128-lane row.
    # Only when the kernel is memory-bound (small d_ff), since kron(I, W) makes the
    # MXU do fold x extra FLOPs on structural zeros.
    fold = 1
    if d_model < 128 and 128 % d_model == 0 and d_ff <= fold_max_dff:
        fold = 128 // d_model

    if fold > 1:
        eye = jnp.eye(fold, dtype=w1.dtype)
        w1e = jnp.kron(eye, w1)                   # (fold*d_model, fold*d_ff)
        w2e = jnp.kron(eye, w2)                   # (fold*d_ff, fold*d_model)
        b1e = jnp.tile(b1, fold)
        b2e = jnp.tile(b2, fold)
    else:
        w1e, b1e, w2e, b2e = w1, b1, w2, b2

    Din0, Dff0 = w1e.shape
    Dout0 = w2e.shape[1]

    # Zero-pad every axis to a multiple of 128: full-lane loads/stores (no vst.msk)
    # and a hidden axis that tiles cleanly.  Padding is exact (zero rows/cols/bias).
    Din = _round_up(Din0, 128)
    Dff = _round_up(Dff0, 128)
    Dout = _round_up(Dout0, 128)
    w1e = jnp.pad(w1e, ((0, Din - Din0), (0, Dff - Dff0)))
    w2e = jnp.pad(w2e, ((0, Dff - Dff0), (0, Dout - Dout0)))
    b1e = jnp.pad(b1e, (0, Dff - Dff0))
    b2e = jnp.pad(b2e, (0, Dout - Dout0))

    return PreparedFFN(
        w1=w1e.astype(jnp.bfloat16),
        b1=b1e.astype(jnp.float32).reshape(1, Dff),
        w2=w2e.astype(jnp.bfloat16),
        b2=b2e.astype(jnp.float32).reshape(1, Dout),
        d_model=d_model, d_ff=d_ff, fold=fold, Din=Din, Dff=Dff, Dout=Dout)


# ---------------------------------------------------------------------------
# Forward wrapper
# ---------------------------------------------------------------------------
def position_wise_ffn(x, params: PreparedFFN, *, tm=256, out_dtype=None):
    """x: (B, S, d_model). Returns (B, S, d_model) (eval-mode FFN, dropout=identity)."""
    B, S, d_model = x.shape
    assert d_model == params.d_model
    out_dtype = x.dtype if out_dtype is None else jnp.dtype(out_dtype)
    fold, Din, Dff, Dout = params.fold, params.Din, params.Dff, params.Dout

    x_bytes = x.dtype.itemsize
    out_bytes = jnp.dtype(out_dtype).itemsize
    row_align = 8 if (x_bytes == 4 and out_bytes == 4) else 16

    M = B * S
    x2 = x.reshape(M, d_model)

    # ---- lane-dense input layout --------------------------------------------
    if fold > 1:
        M_f = _round_up(M, fold)
        if M_f != M:
            x2 = jnp.pad(x2, ((0, M_f - M), (0, 0)))
        Mr = M_f // fold
        xr = x2.reshape(Mr, fold * d_model)       # pure row-major reshape
    else:
        M_f = M
        Mr = M
        xr = x2
    if xr.shape[1] != Din:                        # zero-pad features to 128-lane width
        xr = jnp.pad(xr, ((0, 0), (0, Din - xr.shape[1])))

    # ---- generation-aware VMEM budget (per TensorCore) ------------------------
    try:
        vmem_cap = int(pltpu.get_tpu_info().vmem_capacity_bytes)
    except Exception:
        vmem_cap = 64 * 1024 * 1024               # conservative (v7x per-TC)
    budget = int(vmem_cap * 0.7)

    def footprint(tm_e, tk):
        f = 2 * tm_e * Din * x_bytes              # x tile, double buffered
        f += 2 * Din * tk * 2                     # W1 chunk (bf16), double buffered
        f += 2 * tk * 4                           # b1 chunk
        f += 2 * tk * Dout * 2                    # W2 chunk (bf16), double buffered
        f += 2 * Dout * 4                         # b2
        f += 2 * tm_e * Dout * out_bytes          # out tile, double buffered
        f += tm_e * Dout * 4                      # f32 accumulator scratch
        f += tm_e * tk * 4                        # f32 hidden intermediate
        return f

    # ---- balanced row tiling; keep >= 2 tiles for v7x's 2 TensorCores ---------
    n_row = max(1, _cdiv(Mr, tm))
    tm_eff = _round_up(_cdiv(Mr, n_row), row_align)
    if _round_up(Mr, tm_eff) // tm_eff < 2 and tm_eff >= 2 * row_align:
        tm_eff = _round_up(_cdiv(tm_eff, 2), row_align)

    # ---- d_ff chunk: largest 128-multiple divisor of Dff that fits the budget -
    nff = Dff // 128
    tk_ff = 128
    for d in range(nff, 0, -1):
        if nff % d == 0 and footprint(tm_eff, 128 * d) <= budget:
            tk_ff = 128 * d
            break
    # If even the smallest hidden chunk does not fit, shrink the row tile.
    while footprint(tm_eff, tk_ff) > budget and tm_eff > row_align:
        tm_eff = max(row_align, _round_up(tm_eff // 2, row_align))

    Mr_pad = _round_up(Mr, tm_eff)
    if Mr_pad != Mr:
        xr = jnp.pad(xr, ((0, Mr_pad - Mr), (0, 0)))

    row_tiles = Mr_pad // tm_eff
    kt = Dff // tk_ff
    grid = (row_tiles, kt)

    fp = footprint(tm_eff, tk_ff)
    vmem_limit = int(min(budget, max(int(fp * 1.5), 16 * 1024 * 1024)))

    weight_bytes = ((params.w1.size + params.w2.size) * 2
                    + (params.b1.size + params.b2.size) * 4)
    cost = pl.CostEstimate(
        flops=2 * Mr_pad * Din * Dff + 2 * Mr_pad * Dff * Dout,
        transcendentals=0,
        bytes_accessed=(xr.size * x_bytes
                        + Mr_pad * Dout * out_bytes
                        + weight_bytes * (row_tiles if kt > 1 else 1)),
    )

    out_f = pl.pallas_call(
        ffn_kernel,
        out_shape=jax.ShapeDtypeStruct((Mr_pad, Dout), out_dtype),
        grid_spec=pltpu.PrefetchScalarGridSpec(
            num_scalar_prefetch=0,
            grid=grid,
            in_specs=[
                pl.BlockSpec((tm_eff, Din), lambda i, k: (i, 0)),   # x (const over k)
                pl.BlockSpec((Din, tk_ff), lambda i, k: (0, k)),    # W1 d_ff chunk
                pl.BlockSpec((1, tk_ff), lambda i, k: (0, k)),      # b1 chunk
                pl.BlockSpec((tk_ff, Dout), lambda i, k: (k, 0)),   # W2 d_ff chunk
                pl.BlockSpec((1, Dout), lambda i, k: (0, 0)),       # b2
            ],
            out_specs=pl.BlockSpec((tm_eff, Dout), lambda i, k: (i, 0)),
            scratch_shapes=[pltpu.VMEM((tm_eff, Dout), jnp.float32)],
        ),
        compiler_params=pltpu.CompilerParams(
            dimension_semantics=("parallel", "arbitrary"),
            vmem_limit_bytes=vmem_limit,
        ),
        cost_estimate=cost,
    )(xr, params.w1, params.b1, params.w2, params.b2)

    if fold > 1:
        out = out_f[:Mr].reshape(M_f, d_model)[:M]
    else:
        out = out_f[:M, :d_model]
    return out.reshape(B, S, d_model)


def init_params(key, d_model, d_ff):
    # Deterministic init mirroring nn.Linear's U(-1/sqrt(fan_in), 1/sqrt(fan_in)).
    k1, k2, k3, k4 = jax.random.split(key, 4)
    lim1 = 1.0 / jnp.sqrt(d_model)
    lim2 = 1.0 / jnp.sqrt(d_ff)
    w1 = jax.random.uniform(k1, (d_model, d_ff), jnp.float32, -lim1, lim1)
    b1 = jax.random.uniform(k2, (d_ff,), jnp.float32, -lim1, lim1)
    w2 = jax.random.uniform(k3, (d_ff, d_model), jnp.float32, -lim2, lim2)
    b2 = jax.random.uniform(k4, (d_model,), jnp.float32, -lim2, lim2)
    return w1, b1, w2, b2


if __name__ == "__main__":
    key = jax.random.PRNGKey(0)

    # --- primary small test: lane-dense fold path (d_model=32 divides 128) -----
    B, S, d_model, d_ff = 2, 8, 32, 64
    kx, kp, kx2, kp2 = jax.random.split(key, 4)
    x = jax.random.normal(kx, (B, S, d_model), jnp.float32)
    w1, b1, w2, b2 = init_params(kp, d_model, d_ff)

    params = prepare_ffn_params(w1, b1, w2, b2)   # one-time weight prep (hoisted)
    out = position_wise_ffn(x, params)
    out = jax.block_until_ready(out)

    ref = jnp.maximum(x @ w1 + b1, 0.0) @ w2 + b2
    assert out.shape == (B, S, d_model)
    assert jnp.allclose(out, ref, atol=5e-2, rtol=5e-2), float(
        jnp.max(jnp.abs(out - ref)))

    # --- secondary test: zero-padding path (d_model=96 not a divisor of 128) ---
    d_model2, d_ff2 = 96, 128
    x2 = jax.random.normal(kx2, (B, S, d_model2), jnp.float32)
    p2 = init_params(kp2, d_model2, d_ff2)
    params2 = prepare_ffn_params(*p2)
    out2 = jax.block_until_ready(position_wise_ffn(x2, params2))
    ref2 = jnp.maximum(x2 @ p2[0] + p2[1], 0.0) @ p2[2] + p2[3]
    assert out2.shape == (B, S, d_model2)
    assert jnp.allclose(out2, ref2, atol=5e-2, rtol=5e-2), float(
        jnp.max(jnp.abs(out2 - ref2)))

    print("KERNEL_OK")
</pallas_src>

<mosaic_0001>
module attributes {stable_mosaic.version = 11 : i64} {
  func.func @ffn_kernel(%arg0: i32, %arg1: i32, %arg2: memref<8x128xf32, #tpu.memory_space<vmem>>, %arg3: memref<128x256xbf16, #tpu.memory_space<vmem>>, %arg4: memref<1x256xf32, #tpu.memory_space<vmem>>, %arg5: memref<256x128xbf16, #tpu.memory_space<vmem>>, %arg6: memref<1x128xf32, #tpu.memory_space<vmem>>, %arg7: memref<8x128xf32, #tpu.memory_space<vmem>>, %arg8: memref<8x128xf32, #tpu.memory_space<vmem>>) attributes {dimension_semantics = [#tpu.dimension_semantics<parallel>, #tpu.dimension_semantics<arbitrary>], iteration_bounds = array<i64: 1, 1>, scalar_prefetch = 0 : i64, scratch_operands = 1 : i64, tpu.core_type = #tpu.core_type<tc>, window_params = [{transform_indices = @transform_0, window_bounds = array<i64: 8, 128>}, {transform_indices = @transform_1, window_bounds = array<i64: 128, 256>}, {transform_indices = @transform_2, window_bounds = array<i64: 1, 256>}, {transform_indices = @transform_3, window_bounds = array<i64: 256, 128>}, {pipeline_mode = #tpu.pipeline_mode<synchronous>, transform_indices = @transform_4, window_bounds = array<i64: 1, 128>}, {transform_indices = @transform_5, window_bounds = array<i64: 8, 128>}]} {
    %c0_i32 = arith.constant 0 : i32
    %0 = arith.cmpi eq, %arg1, %c0_i32 : i32
    %1 = arith.extui %0 : i1 to i32
    %c0_i32_0 = arith.constant 0 : i32
    %2 = arith.cmpi ne, %1, %c0_i32_0 : i32
    scf.if %2 {
      %cst_16 = arith.constant 0.000000e+00 : f32
      %21 = vector.broadcast %cst_16 : f32 to vector<8x128xf32>
      %c0_17 = arith.constant 0 : index
      %c0_18 = arith.constant 0 : index
      %22 = vector.load %arg8[%c0_17, %c0_18] : memref<8x128xf32, #tpu.memory_space<vmem>>, vector<8x128xf32>
      tpu.vector_store %arg8[%c0_17, %c0_18], %21 {strides = array<i32>} : memref<8x128xf32, #tpu.memory_space<vmem>>, vector<8x128xf32>,
    } else {
    }
    %c0 = arith.constant 0 : index
    %c0_1 = arith.constant 0 : index
    %3 = vector.load %arg2[%c0, %c0_1] : memref<8x128xf32, #tpu.memory_space<vmem>>, vector<8x128xf32>
    %4 = arith.truncf %3 : vector<8x128xf32> to vector<8x128xbf16>
    %c0_2 = arith.constant 0 : index
    %c0_3 = arith.constant 0 : index
    %5 = vector.load %arg3[%c0_2, %c0_3] : memref<128x256xbf16, #tpu.memory_space<vmem>>, vector<128x256xbf16>
    %cst = arith.constant dense<0.000000e+00> : vector<8x256xf32>
    %6 = tpu.matmul %4, %5, %cst {dimension_numbers = #tpu.dot_dimension_numbers<[1], [0], [0], [1], [0, 0, 1, 1], [], []>} : vector<8x128xbf16>, vector<128x256xbf16>, vector<8x256xf32> -> vector<8x256xf32>
    %c0_4 = arith.constant 0 : index
    %c0_5 = arith.constant 0 : index
    %7 = vector.load %arg4[%c0_4, %c0_5] : memref<1x256xf32, #tpu.memory_space<vmem>>, vector<1x256xf32>
    %8 = vector.broadcast %7 : vector<1x256xf32> to vector<8x256xf32>
    %9 = arith.addf %6, %8 : vector<8x256xf32>
    %cst_6 = arith.constant 0.000000e+00 : f32
    %10 = vector.broadcast %cst_6 : f32 to vector<8x256xf32>
    %11 = arith.maximumf %9, %10 : vector<8x256xf32>
    %c0_7 = arith.constant 0 : index
    %c0_8 = arith.constant 0 : index
    %12 = vector.load %arg8[%c0_7, %c0_8] : memref<8x128xf32, #tpu.memory_space<vmem>>, vector<8x128xf32>
    %13 = arith.truncf %11 : vector<8x256xf32> to vector<8x256xbf16>
    %c0_9 = arith.constant 0 : index
    %c0_10 = arith.constant 0 : index
    %14 = vector.load %arg5[%c0_9, %c0_10] : memref<256x128xbf16, #tpu.memory_space<vmem>>, vector<256x128xbf16>
    %cst_11 = arith.constant dense<0.000000e+00> : vector<8x128xf32>
    %15 = tpu.matmul %13, %14, %cst_11 {dimension_numbers = #tpu.dot_dimension_numbers<[1], [0], [0], [1], [0, 0, 1, 1], [], []>} : vector<8x256xbf16>, vector<256x128xbf16>, vector<8x128xf32> -> vector<8x128xf32>
    %16 = arith.addf %12, %15 : vector<8x128xf32>
    %c0_12 = arith.constant 0 : index
    %c0_13 = arith.constant 0 : index
    %17 = vector.load %arg8[%c0_12, %c0_13] : memref<8x128xf32, #tpu.memory_space<vmem>>, vector<8x128xf32>
    tpu.vector_store %arg8[%c0_12, %c0_13], %16 {strides = array<i32>} : memref<8x128xf32, #tpu.memory_space<vmem>>, vector<8x128xf32>,
    %c0_i32_14 = arith.constant 0 : i32
    %18 = arith.cmpi eq, %arg1, %c0_i32_14 : i32
    %19 = arith.extui %18 : i1 to i32
    %c0_i32_15 = arith.constant 0 : i32
    %20 = arith.cmpi ne, %19, %c0_i32_15 : i32
    scf.if %20 {
      %c0_16 = arith.constant 0 : index
      %c0_17 = arith.constant 0 : index
      %21 = vector.load %arg8[%c0_16, %c0_17] : memref<8x128xf32, #tpu.memory_space<vmem>>, vector<8x128xf32>
      %c0_18 = arith.constant 0 : index
      %c0_19 = arith.constant 0 : index
      %22 = vector.load %arg6[%c0_18, %c0_19] : memref<1x128xf32, #tpu.memory_space<vmem>>, vector<1x128xf32>
      %23 = vector.broadcast %22 : vector<1x128xf32> to vector<8x128xf32>
      %24 = arith.addf %21, %23 : vector<8x128xf32>
      %c0_20 = arith.constant 0 : index
      %c0_21 = arith.constant 0 : index
      %25 = vector.load %arg7[%c0_20, %c0_21] : memref<8x128xf32, #tpu.memory_space<vmem>>, vector<8x128xf32>
      tpu.vector_store %arg7[%c0_20, %c0_21], %24 {strides = array<i32>} : memref<8x128xf32, #tpu.memory_space<vmem>>, vector<8x128xf32>,
    } else {
    }
    return
  }
  func.func @transform_0(%arg0: i32, %arg1: i32) -> (i32, i32) {
    %c0_i32 = arith.constant 0 : i32
    %c0_i32_0 = arith.constant 0 : i32
    return %arg0, %c0_i32 : i32, i32
  }
  func.func @transform_1(%arg0: i32, %arg1: i32) -> (i32, i32) {
    %c0_i32 = arith.constant 0 : i32
    %c0_i32_0 = arith.constant 0 : i32
    return %c0_i32, %arg1 : i32, i32
  }
  func.func @transform_2(%arg0: i32, %arg1: i32) -> (i32, i32) {
    %c0_i32 = arith.constant 0 : i32
    %c0_i32_0 = arith.constant 0 : i32
    return %c0_i32, %arg1 : i32, i32
  }
  func.func @transform_3(%arg0: i32, %arg1: i32) -> (i32, i32) {
    %c0_i32 = arith.constant 0 : i32
    %c0_i32_0 = arith.constant 0 : i32
    return %arg1, %c0_i32 : i32, i32
  }
  func.func @transform_4(%arg0: i32, %arg1: i32) -> (i32, i32) {
    %c0_i32 = arith.constant 0 : i32
    %c0_i32_0 = arith.constant 0 : i32
    %c0_i32_1 = arith.constant 0 : i32
    return %c0_i32, %c0_i32_0 : i32, i32
  }
  func.func @transform_5(%arg0: i32, %arg1: i32) -> (i32, i32) {
    %c0_i32 = arith.constant 0 : i32
    %c0_i32_0 = arith.constant 0 : i32
    return %arg0, %c0_i32 : i32, i32
  }
}

</mosaic_0001>

<bundles_post_ra>
// kernel: tpu_custom_call.1
= control target key start
LH: loop header
LB: loop body
LE: loop exit
PB: predicated region body
PF: predicated region fallthrough
CT: control target
= control target key end

     0   :  { %10 = vsyncpa [#allocation4], 0  ;;  %s712_s0 = inlined_call_operand.hbm [shape: f32[8,128], index: 0, kind: input, shape index: {}]   ;;  %s713_s1 = inlined_call_operand.hbm [shape: bf16[128,256], index: 1, kind: input, shape index: {}]   ;;  %s714_s2 = inlined_call_operand.vmem [shape: f32[1,256], index: 2, kind: input, shape index: {}]   ;;  %s715_s3 = inlined_call_operand.hbm [shape: bf16[256,128], index: 3, kind: input, shape index: {}]   ;;  %s716_s4 = inlined_call_operand.vmem [shape: f32[1,128], index: 4, kind: input, shape index: {}]   ;;  %s717_s5 = inlined_call_operand.hbm [shape: f32[8,128], index: 5, kind: output, shape index: {}]  }
   0x1   :  { %11 = vsyncpa [#allocation7], 0 }
   0x2   :  { %12 = vsyncpa [#allocation5], 0  ;;  %s619_s18 = smov [#allocation6]   ;;  %s525_s22 = scalar_lea.hbm %s713_s1, 2048 }
   0x3   :  { %s28_s19 = sshll.u32 %s619_s18, 4  ;;  %p526_p0 = scmp.ne.s32.totalorder %s713_s1, %s525_s22  ;;  %s29_s19 = int_to_ptr.vmem [resolvable:$true] %s28_s19 }
   0x4   :  { %p529_p1 = scmp.lt.u32.totalorder %s525_s22, %s713_s1 }
   0x6   :  { %p531_p2 = pnand %p529_p1, %p526_p0 }
   0x8   :  { %534 = shalt.err (!%p531_p2)
}
   0x9   :  { %s535_s27 = scalar_lea.vmem %s29_s19, 2048  ;;  %p540_p4 = scmp.lt.s32.totalorder %s29_s19, %s29_s19 }
   0xa   :  { %p536_p3 = scmp.ne.s32.totalorder %s29_s19, %s535_s27  ;;  %p541_p5 = scmp.lt.s32.totalorder %s535_s27, %s535_s27 }
   0xc   :  { %p542_p6 = por %p541_p5, %p540_p4 }
   0xe   :  { %p543_p7 = pnand %p542_p6, %p536_p3 }
  0x10   :  { %546 = shalt.err (!%p543_p7)
}
  0x11   :  { %s620_s28 = smov 128   ;;  %s621_s29 = smov 8  }
  0x12   :  { %34 = dma.hbm_to_vmem [thread:$0]  %s713_s1, 2048, %s29_s19, [#allocation7], %s620_s28, %s620_s28, %s621_s29  }
  0x13   :  { %s622_s7 = smov [#allocation3]   ;;  %s623_s9 = smov [#allocation8]  }
  0x14   :  { %s19_s8 = sshll.u32 %s622_s7, 4  ;;  %s42_s10 = sshll.u32 %s623_s9, 4  ;;  %s20_s8 = int_to_ptr.vmem [resolvable:$true] %s19_s8  ;;  %s43_s10 = int_to_ptr.vmem [resolvable:$true] %s42_s10 }
  0x15   :  { %s547_s13 = scalar_lea.hbm %s712_s0, 128 }
  0x16   :  { %p548_p8 = scmp.ne.s32.totalorder %s712_s0, %s547_s13  ;;  %p551_p9 = scmp.lt.u32.totalorder %s547_s13, %s712_s0 }
  0x18   :  { %p553_p10 = pnand %p551_p9, %p548_p8 }
  0x1a   :  { %556 = shalt.err (!%p553_p10)
}
  0x1b   :  { %s557_s1 = scalar_lea.vmem %s20_s8, 128  ;;  %p562_p12 = scmp.lt.s32.totalorder %s20_s8, %s20_s8 }
  0x1c   :  { %p558_p11 = scmp.ne.s32.totalorder %s20_s8, %s557_s1  ;;  %p563_p13 = scmp.lt.s32.totalorder %s557_s1, %s557_s1 }
  0x1e   :  { %p564_p0 = por %p563_p13, %p562_p12 }
  0x20   :  { %p565_p1 = pnand %p564_p0, %p558_p11 }
  0x22   :  { %568 = shalt.err (!%p565_p1)
}
  0x23   :  { %22 = dma.hbm_to_vmem [thread:$0]  %s712_s0, 128, %s20_s8, [#allocation4]  }
  0x24   :  { %s569_s22 = scalar_lea.hbm %s715_s3, 2048 }
  0x25   :  { %p570_p2 = scmp.ne.s32.totalorder %s715_s3, %s569_s22  ;;  %p573_p3 = scmp.lt.u32.totalorder %s569_s22, %s715_s3 }
  0x27   :  { %p575_p4 = pnand %p573_p3, %p570_p2 }
  0x29   :  { %578 = shalt.err (!%p575_p4)
}
  0x2a   :  { %s579_s27 = scalar_lea.vmem %s43_s10, 2048  ;;  %p584_p6 = scmp.lt.s32.totalorder %s43_s10, %s43_s10 }
  0x2b   :  { %p580_p5 = scmp.ne.s32.totalorder %s43_s10, %s579_s27  ;;  %p585_p7 = scmp.lt.s32.totalorder %s579_s27, %s579_s27 }
  0x2d   :  { %p586_p8 = por %p585_p7, %p584_p6 }
  0x2f   :  { %p587_p9 = pnand %p586_p8, %p580_p5 }
  0x31   :  { %590 = shalt.err (!%p587_p9)
}
  0x32   :  { %s624_s0 = smov 64   ;;  %s625_s28 = smov 4  }
  0x33   :  { %48 = dma.hbm_to_vmem [thread:$0]  %s715_s3, 2048, %s43_s10, [#allocation7], %s624_s0, %s624_s0, %s625_s28  }
  0x34   :  { %613 = dma.done.wait [#allocation4], 128  }
  0x35   :  { %614 = vsyncadd [#allocation4], 4294967168 }
  0x36   :  { %615 = dma.done.wait [#allocation7], 4096  }
  0x37   :  { %616 = vsyncadd [#allocation7], 4294963200  ;;  %v626_v0 = vmov 0   ;;  %v485_v1 = vld [vmem:[#allocation6 + $0x4] ss:$8 sps:$4 sm:$0xff]   ;;  %v513_v15 = vld [vmem:[#allocation8 + $0x50] sm:$0xff]   ;;  %v86_v35 = vlaneseq }
  0x38   :  { %208 = vmatprep.mubr.bf16.mxu0 %v626_v0  ;;  %v487_v2 = vld [vmem:[#allocation6] ss:$8 sps:$4 sm:$0xff]   ;;  %176 = vmatprep.subr.bf16.mxu0 %v485_v1  ;;  %v488_v3 = vld [vmem:[#allocation6 + $0x14] ss:$8 sps:$4 sm:$0xff]   ;;  %v490_v4 = vld [vmem:[#allocation6 + $0x10] ss:$8 sps:$4 sm:$0xff]  }
  0x39   :  { %177 = vmatpush1.bf16.msra.mxu0 %v487_v2  ;;  %v491_v5 = vld [vmem:[#allocation6 + $0x24] ss:$8 sps:$4 sm:$0xff]   ;;  %v493_v6 = vld [vmem:[#allocation6 + $0x20] ss:$8 sps:$4 sm:$0xff]   ;;  %v494_v7 = vld [vmem:[#allocation6 + $0x34] ss:$8 sps:$4 sm:$0xff]  }
  0x3a   :  { %178 = vmatprep.subr.bf16.mxu0 %v488_v3  ;;  %v496_v8 = vld [vmem:[#allocation6 + $0x30] ss:$8 sps:$4 sm:$0xff]   ;;  %v497_v9 = vld [vmem:[#allocation6 + $0x44] ss:$8 sps:$4 sm:$0xff]   ;;  %v499_v12 = vld [vmem:[#allocation6 + $0x40] ss:$8 sps:$4 sm:$0xff]  }
  0x3b   :  { %v509_v10 = vld [vmem:[#allocation8 + $0x40] sm:$0xff]   ;;  %v511_v13 = vld [vmem:[#allocation8 + $0x48] sm:$0xff]   ;;  %v500_v16 = vld [vmem:[#allocation6 + $0x54] ss:$8 sps:$4 sm:$0xff]   ;;  %v87_v36 = vshrl.u32 %v86_v35, 7 }
  0x3c   :  { %v510_v11 = vld [vmem:[#allocation8] sm:$0xff]   ;;  %454 = vmatprep.subr.bf16.mxu1 %v509_v10  ;;  %v512_v14 = vld [vmem:[#allocation8 + $0x8] sm:$0xff]   ;;  %v502_v17 = vld [vmem:[#allocation6 + $0x50] ss:$8 sps:$4 sm:$0xff]  }
  0x3d   :  { %179 = vmatpush1.bf16.msra.mxu0 %v490_v4  ;;  %455 = vmatpush3.bf16.msra.mxu1 %v510_v11  ;;  %v514_v18 = vld [vmem:[#allocation8 + $0x10] sm:$0xff]   ;;  %v515_v19 = vld [vmem:[#allocation8 + $0x58] sm:$0xff]   ;;  %v503_v20 = vld [vmem:[#allocation6 + $0x64] ss:$8 sps:$4 sm:$0xff]   ;;  %v88_v37 = vsub.s32 0, %v87_v36  ;;  %v92_v39 = vsub.s32 1, %v87_v36 }
  0x3e   :  { %180 = vmatprep.subr.bf16.mxu0 %v491_v5  ;;  %456 = vmatprep.subr.bf16.mxu1 %v511_v13  ;;  %v505_v21 = vld [vmem:[#allocation6 + $0x60] ss:$8 sps:$4 sm:$0xff]   ;;  %v506_v22 = vld [vmem:[#allocation6 + $0x74] ss:$8 sps:$4 sm:$0xff]   ;;  %v508_v26 = vld [vmem:[#allocation6 + $0x70] ss:$8 sps:$4 sm:$0xff]  }
  0x3f   :  { %v516_v23 = vld [vmem:[#allocation8 + $0x18] sm:$0xff]   ;;  %v517_v24 = vld [vmem:[#allocation8 + $0x60] sm:$0xff]   ;;  %v519_v28 = vld [vmem:[#allocation8 + $0x68] sm:$0xff]  }
  0x40   :  { %v518_v25 = vld [vmem:[#allocation8 + $0x20] sm:$0xff]   ;;  %v66_v27 = vld [vmem:[#allocation3] sm:$0xff]  ;;  %v520_v30 = vld [vmem:[#allocation8 + $0x28] sm:$0xff]  }
  0x41   :  { %181 = vmatpush1.bf16.msra.mxu0 %v493_v6  ;;  %457 = vmatpush3.bf16.msra.mxu1 %v512_v14  ;;  %v67_v29 = vpack.c.bf16 %v66_v27, %v66_v27  ;;  %v521_v31 = vld [vmem:[#allocation8 + $0x70] sm:$0xff]   ;;  %v523_v33 = vld [vmem:[#allocation8 + $0x78] sm:$0xff]  }
  0x42   :  { %182 = vmatprep.subr.bf16.mxu0 %v494_v7  ;;  %458 = vmatprep.subr.bf16.mxu1 %v513_v15  ;;  %v522_v32 = vld [vmem:[#allocation8 + $0x30] sm:$0xff]   ;;  %v524_v34 = vld [vmem:[#allocation8 + $0x38] sm:$0xff]  }
  0x43   :  { %v84_v38 = vld [vmem:[%s714_s2] sm:$0x3]  ;;  %s627_s2 = smov [#allocation9]  }
  0x44   :  { %v89_v40 = vrot.slane %v84_v38, %v88_v37  ;;  %v93_v41 = vrot.slane %v84_v38, %v92_v39  ;;  %v453_v54 = vld [vmem:[%s716_s4] ss:$0 sm:$0xff]  ;;  %s411_s9 = sshll.u32 %s627_s2, 4  ;;  %s412_s9 = int_to_ptr.vmem [resolvable:$true] %s411_s9 }
  0x45   :  { %183 = vmatpush1.bf16.msra.mxu0 %v496_v8  ;;  %459 = vmatpush3.bf16.msra.mxu1 %v514_v18  ;;  %s591_s10 = scalar_lea.vmem %s412_s9, 128  ;;  %p596_p11 = scmp.lt.s32.totalorder %s412_s9, %s412_s9 }
  0x46   :  { %184 = vmatprep.subr.bf16.mxu0 %v497_v9  ;;  %460 = vmatprep.subr.bf16.mxu1 %v515_v19  ;;  %p592_p10 = scmp.ne.s32.totalorder %s412_s9, %s591_s10  ;;  %p597_p12 = scmp.lt.s32.totalorder %s591_s10, %s591_s10 }
  0x48   :  { %p598_p13 = por %p597_p12, %p596_p11 }
  0x49   :  { %185 = vmatpush1.bf16.msra.mxu0 %v499_v12  ;;  %461 = vmatpush3.bf16.msra.mxu1 %v516_v23 }
  0x4a   :  { %186 = vmatprep.subr.bf16.mxu0 %v500_v16  ;;  %462 = vmatprep.subr.bf16.mxu1 %v517_v24  ;;  %p599_p0 = pnand %p598_p13, %p592_p10 }
  0x4d   :  { %187 = vmatpush1.bf16.msra.mxu0 %v502_v17  ;;  %463 = vmatpush3.bf16.msra.mxu1 %v518_v25 }
  0x4e   :  { %188 = vmatprep.subr.bf16.mxu0 %v503_v20  ;;  %464 = vmatprep.subr.bf16.mxu1 %v519_v28 }
  0x51   :  { %189 = vmatpush1.bf16.msra.mxu0 %v505_v21  ;;  %465 = vmatpush3.bf16.msra.mxu1 %v520_v30 }
  0x52   :  { %190 = vmatprep.subr.bf16.mxu0 %v506_v22  ;;  %466 = vmatprep.subr.bf16.mxu1 %v521_v31 }
  0x55   :  { %191 = vmatpush1.bf16.msra.mxu0 %v508_v26  ;;  %467 = vmatpush3.bf16.msra.mxu1 %v522_v32 }
  0x56   :  { %468 = vmatprep.subr.bf16.mxu1 %v523_v33 }
  0x58   :  { %209 = vmatmul.mubr.bf16.vlgmr.msra.gmra.mrb[0].mxu0 %v67_v29 }
  0x59   :  { %469 = vmatpush3.bf16.msra.mxu1 %v524_v34 }
 0x12b   :  { %v210_v42 = vpop.f32.mrb[0].mxu0 }
 0x12c   :  { %v211_v43 = vadd.f32 %v210_v42, %v89_v40  ;;  %v212_v44 = vpop.f32.mrb[1].mxu0 }
 0x12d   :  { %v213_v45 = vadd.f32 %v212_v44, %v93_v41  ;;  %v214_v46 = vpop.f32.mrb[2].mxu0 }
 0x12e   :  { %v217_v47 = vmax.f32 %v211_v43, 0.0  ;;  %v215_v48 = vpop.f32.mrb[3].mxu0 }
 0x12f   :  { %v218_v49 = vmax.f32 %v213_v45, 0.0 }
 0x130   :  { %v220_v51 = vpack.c.bf16 %v217_v47, %v217_v47 }
 0x131   :  { %v221_v50 = vpack.c.bf16 %v218_v49, %v218_v49 }
 0x133   :  { %382 = vmatprep.mubr.bf16.mxu1 %v221_v50 }
 0x134   :  { %383 = vmatmul.mubr.bf16.vlgmr.msra.gmra.mrb[0].mxu1 %v220_v51 }
 0x207   :  { %v470_v52 = vpop.f32.mrb[0].mxu1 }
 0x208   :  { %v471_v53 = vpop.f32.mrb[1].mxu1 }
 0x209   :  { %v472_v55 = vadd.f32 %v471_v53, %v470_v52  ;;  %v473_v56 = vpop.f32.mrb[2].mxu1 }
 0x20a   :  { %v474_v57 = vpop.f32.mrb[3].mxu1 }
 0x20b   :  { %v403_v58 = vadd.f32 %v472_v55, %v453_v54 }
 0x20d   :  { %404 = vst [vmem:[#allocation9] sm:$0xff] %v403_v58 }
 0x20e   :  { %602 = shalt.err (!%p599_p0)
}
 0x20f   :  { %s603_s13 = scalar_lea.hbm %s717_s5, 128 }
 0x210   :  { %p604_p1 = scmp.ne.s32.totalorder %s717_s5, %s603_s13  ;;  %p607_p2 = scmp.lt.u32.totalorder %s603_s13, %s717_s5 }
 0x212   :  { %p609_p3 = pnand %p607_p2, %p604_p1 }
 0x214   :  { %612 = shalt.err (!%p609_p3)
}
 0x215   :  { %414 = dma.vmem_to_hbm [thread:$0]  %s412_s9, 128, %s717_s5, [#allocation5]  }
 0x216   :  { %617 = dma.done.wait [#allocation5], 128  }
 0x217   :  { %618 = vsyncadd [#allocation5], 4294967168 }
 0x218   :  { %418 = vsyncpa [#allocation4], 1 }
 0x219   :  { %419 = vsyncpa [#allocation7], 1 }
 0x21a   :  { %420 = vsyncpa [#allocation5], 1 }

</bundles_post_ra>
